<compile_context>
chip_gen: v6e
topology: v6e:2x2x1
jax: 0.10.0
libtpu: 0.0.40
codegen_flags: <defaults>
</compile_context>

<pallas_src>
import math

import jax
import jax.numpy as jnp
from jax.experimental import pallas as pl
from jax.experimental.pallas import tpu as pltpu


def _round_up(n, m):
    return ((n + m - 1) // m) * m


def _tpu_vmem_bytes():
    """Best-effort physical VMEM query; conservative 64 MiB fallback."""
    try:
        info = pltpu.get_tpu_info()
        return int(getattr(info, "vmem_capacity_bytes", 64 * 1024 * 1024))
    except Exception:
        return 64 * 1024 * 1024


def _gwl_kernel_full_d(x_ref, w_ref, b_ref, o_ref):
    # x_ref: (TB, C, D)  w_ref: (1, C, D)  b_ref: (1, C)  o_ref: (TB, C)
    # Multiply in the native dtype (weight broadcasts over the batch rows),
    # reduce the hidden dim (lane axis) with f32 accumulation, add bias.
    s = jnp.sum(x_ref[...] * w_ref[...], axis=-1, dtype=jnp.float32)
    o_ref[...] = (s + b_ref[...].astype(jnp.float32)).astype(o_ref.dtype)


def _gwl_kernel_tiled_d(x_ref, w_ref, b_ref, o_ref, acc_ref):
    # Fallback path for very large hidden dims: D is tiled on the innermost
    # ("arbitrary") grid axis and partial sums accumulate in f32 scratch.
    ki = pl.program_id(1)

    @pl.when(ki == 0)
    def _init():
        acc_ref[...] = jnp.zeros_like(acc_ref)

    acc_ref[...] += jnp.sum(x_ref[...] * w_ref[...], axis=-1, dtype=jnp.float32)

    @pl.when(ki == pl.num_programs(1) - 1)
    def _finalize():
        o_ref[...] = (
            acc_ref[...] + b_ref[...].astype(jnp.float32)
        ).astype(o_ref.dtype)


def groupwise_linear(x, weight, bias, *, x_tile_bytes=None, vmem_limit_bytes=None):
    """x: (B, C, D), weight: (1, C, D), bias: (1, C) -> (B, C)."""
    B, C, D = x.shape
    itemsize = jnp.dtype(x.dtype).itemsize

    # ---- per-generation tile budget --------------------------------------
    phys_vmem = _tpu_vmem_bytes()
    if x_tile_bytes is None:
        # ~1/4 of physical VMEM per (double-buffered) x buffer:
        # ~16 MiB on v7x (64 MiB VMEM), ~32 MiB on v5e/v6e (128 MiB VMEM).
        x_tile_bytes = max(8 * 1024 * 1024, min(32 * 1024 * 1024, phys_vmem // 4))
    if vmem_limit_bytes is None:
        # ~48 MiB on v7x, ~96 MiB on v5e/v6e (v5e's scoped default is only 16 MiB).
        vmem_limit_bytes = int(phys_vmem * 3 // 4)

    # ---- tile selection ---------------------------------------------------
    # C is never tiled or padded (sublane axis: multiple of 8 OR full dim).
    if 8 * C * D * itemsize <= x_tile_bytes:
        TD = D                              # common case: full hidden dim per block
    else:
        # D too large for a full-row block: tile it on the lane axis.
        TD = max(128, (x_tile_bytes // (8 * C * itemsize)) // 128 * 128)
        TD = min(TD, _round_up(D, 128))

    row_bytes = C * TD * itemsize
    tb_budget = max(8, (x_tile_bytes // row_bytes) // 8 * 8)
    if B <= tb_budget:
        if B >= 16:
            # Keep >=2 B-blocks so both v7x TensorCores get work (harmless
            # extra grid step on single-TC v5e/v6e).
            TB = max(8, (B // 2) // 8 * 8)
        else:
            TB = B                          # single block, zero padding
    else:
        TB = tb_budget

    Bp = _round_up(B, TB)
    Dp = _round_up(D, TD) if TD != D else D

    # ---- minimal zero-padding (B always safe; D only in the fallback path) -
    pad_b, pad_d = Bp - B, Dp - D
    if pad_b or pad_d:
        x = jnp.pad(x, ((0, pad_b), (0, 0), (0, pad_d)))
    if pad_d:
        weight = jnp.pad(weight, ((0, 0), (0, 0), (0, pad_d)))

    cost = pl.CostEstimate(
        flops=2 * B * C * D,
        transcendentals=0,
        bytes_accessed=(B * C * D + C * D + C + B * C) * itemsize,
    )

    if Dp == TD:
        # ---- fast path: 1-D parallel grid over B, no accumulator ----------
        out = pl.pallas_call(
            _gwl_kernel_full_d,
            out_shape=jax.ShapeDtypeStruct((Bp, C), x.dtype),
            grid=(Bp // TB,),
            in_specs=[
                pl.BlockSpec((TB, C, TD), lambda bi: (bi, 0, 0)),
                pl.BlockSpec((1, C, TD), lambda bi: (0, 0, 0)),
                pl.BlockSpec((1, C), lambda bi: (0, 0)),
            ],
            out_specs=pl.BlockSpec((TB, C), lambda bi: (bi, 0)),
            compiler_params=pltpu.CompilerParams(
                dimension_semantics=("parallel",),
                vmem_limit_bytes=vmem_limit_bytes,
            ),
            cost_estimate=cost,
        )(x, weight, bias)
    else:
        # ---- fallback: (B parallel, D arbitrary) grid with f32 accumulator -
        out = pl.pallas_call(
            _gwl_kernel_tiled_d,
            out_shape=jax.ShapeDtypeStruct((Bp, C), x.dtype),
            grid=(Bp // TB, Dp // TD),
            in_specs=[
                pl.BlockSpec((TB, C, TD), lambda bi, ki: (bi, 0, ki)),
                pl.BlockSpec((1, C, TD), lambda bi, ki: (0, 0, ki)),
                pl.BlockSpec((1, C), lambda bi, ki: (0, 0)),
            ],
            out_specs=pl.BlockSpec((TB, C), lambda bi, ki: (bi, 0)),
            scratch_shapes=[pltpu.VMEM((TB, C), jnp.float32)],
            compiler_params=pltpu.CompilerParams(
                dimension_semantics=("parallel", "arbitrary"),
                vmem_limit_bytes=vmem_limit_bytes,
            ),
            cost_estimate=cost,
        )(x, weight, bias)

    return out[:B] if Bp != B else out


def groupwise_linear_ref(x, weight, bias):
    return jnp.sum(weight * x, axis=-1) + bias


if __name__ == "__main__":
    B, num_class, hidden_dim = 2, 8, 32

    key = jax.random.PRNGKey(0)
    kx, kw, kb = jax.random.split(key, 3)

    # deterministic parameter init mirroring reset_parameters():
    # uniform(-stdv, stdv) with stdv = 1/sqrt(hidden_dim)
    stdv = 1.0 / math.sqrt(hidden_dim)
    weight = jax.random.uniform(
        kw, (1, num_class, hidden_dim), jnp.float32, minval=-stdv, maxval=stdv
    )
    bias = jax.random.uniform(
        kb, (1, num_class), jnp.float32, minval=-stdv, maxval=stdv
    )

    x = jax.random.normal(kx, (B, num_class, hidden_dim), jnp.float32)

    out = groupwise_linear(x, weight, bias)
    out = jax.block_until_ready(out)

    ref = groupwise_linear_ref(x, weight, bias)
    assert out.shape == (B, num_class)
    assert jnp.allclose(out, ref, atol=1e-5, rtol=1e-5)

    print("KERNEL_OK")
</pallas_src>

<mosaic_0001>
module attributes {stable_mosaic.version = 11 : i64} {
  func.func @_gwl_kernel_full_d(%arg0: i32, %arg1: memref<2x8x32xf32, #tpu.memory_space<vmem>>, %arg2: memref<1x8x32xf32, #tpu.memory_space<vmem>>, %arg3: memref<1x8xf32, #tpu.memory_space<vmem>>, %arg4: memref<2x8xf32, #tpu.memory_space<vmem>>) attributes {dimension_semantics = [#tpu.dimension_semantics<parallel>], iteration_bounds = array<i64: 1>, scalar_prefetch = 0 : i64, scratch_operands = 0 : i64, tpu.core_type = #tpu.core_type<tc>, window_params = [{transform_indices = @transform_0, window_bounds = array<i64: 2, 8, 32>}, {pipeline_mode = #tpu.pipeline_mode<synchronous>, transform_indices = @transform_1, window_bounds = array<i64: 1, 8, 32>}, {pipeline_mode = #tpu.pipeline_mode<synchronous>, transform_indices = @transform_2, window_bounds = array<i64: 1, 8>}, {transform_indices = @transform_3, window_bounds = array<i64: 2, 8>}]} {
    %c0 = arith.constant 0 : index
    %c0_0 = arith.constant 0 : index
    %c0_1 = arith.constant 0 : index
    %0 = vector.load %arg1[%c0, %c0_0, %c0_1] : memref<2x8x32xf32, #tpu.memory_space<vmem>>, vector<2x8x32xf32>
    %c0_2 = arith.constant 0 : index
    %c0_3 = arith.constant 0 : index
    %c0_4 = arith.constant 0 : index
    %1 = vector.load %arg2[%c0_2, %c0_3, %c0_4] : memref<1x8x32xf32, #tpu.memory_space<vmem>>, vector<1x8x32xf32>
    %2 = vector.broadcast %1 : vector<1x8x32xf32> to vector<2x8x32xf32>
    %3 = arith.mulf %0, %2 : vector<2x8x32xf32>
    %cst = arith.constant dense<0.000000e+00> : vector<2x8xf32>
    %4 = vector.multi_reduction <add>, %3, %cst [2] : vector<2x8x32xf32> to vector<2x8xf32>
    %c0_5 = arith.constant 0 : index
    %c0_6 = arith.constant 0 : index
    %5 = vector.load %arg3[%c0_5, %c0_6] : memref<1x8xf32, #tpu.memory_space<vmem>>, vector<1x8xf32>
    %6 = vector.broadcast %5 : vector<1x8xf32> to vector<2x8xf32>
    %7 = arith.addf %4, %6 : vector<2x8xf32>
    %c0_7 = arith.constant 0 : index
    %c0_8 = arith.constant 0 : index
    %8 = vector.load %arg4[%c0_7, %c0_8] : memref<2x8xf32, #tpu.memory_space<vmem>>, vector<2x8xf32>
    tpu.vector_store %arg4[%c0_7, %c0_8], %7 {strides = array<i32>} : memref<2x8xf32, #tpu.memory_space<vmem>>, vector<2x8xf32>,
    return
  }
  func.func @transform_0(%arg0: i32) -> (i32, i32, i32) {
    %c0_i32 = arith.constant 0 : i32
    %c0_i32_0 = arith.constant 0 : i32
    %c0_i32_1 = arith.constant 0 : i32
    return %arg0, %c0_i32, %c0_i32_0 : i32, i32, i32
  }
  func.func @transform_1(%arg0: i32) -> (i32, i32, i32) {
    %c0_i32 = arith.constant 0 : i32
    %c0_i32_0 = arith.constant 0 : i32
    %c0_i32_1 = arith.constant 0 : i32
    %c0_i32_2 = arith.constant 0 : i32
    return %c0_i32, %c0_i32_0, %c0_i32_1 : i32, i32, i32
  }
  func.func @transform_2(%arg0: i32) -> (i32, i32) {
    %c0_i32 = arith.constant 0 : i32
    %c0_i32_0 = arith.constant 0 : i32
    %c0_i32_1 = arith.constant 0 : i32
    return %c0_i32, %c0_i32_0 : i32, i32
  }
  func.func @transform_3(%arg0: i32) -> (i32, i32) {
    %c0_i32 = arith.constant 0 : i32
    %c0_i32_0 = arith.constant 0 : i32
    return %arg0, %c0_i32 : i32, i32
  }
}

</mosaic_0001>

<bundles_post_ra>
// kernel: tpu_custom_call.1
= control target key start
LH: loop header
LB: loop body
LE: loop exit
PB: predicated region body
PF: predicated region fallthrough
CT: control target
= control target key end

     0   :  { %8 = vsyncpa [#allocation3], 0  ;;  %s217_s0 = inlined_call_operand.hbm [shape: f32[2,8,32], index: 0, kind: input, shape index: {}]   ;;  %s218_s1 = inlined_call_operand.hbm [shape: f32[1,8,32], index: 1, kind: input, shape index: {}]   ;;  %s219_s2 = inlined_call_operand.vmem [shape: f32[1,8], index: 2, kind: input, shape index: {}]   ;;  %s220_s3 = inlined_call_operand.hbm [shape: f32[2,8], index: 3, kind: output, shape index: {}]  }
   0x1   :  { %9 = vsyncpa [#allocation6], 0 }
   0x2   :  { %10 = vsyncpa [#allocation4], 0  ;;  %s179_s12 = smov [#allocation2]  }
   0x3   :  { %s16_s13 = sshll.u32 %s179_s12, 4  ;;  %s17_s13 = int_to_ptr.vmem [resolvable:$true] %s16_s13 }
   0x4   :  { %s121_s14 = scalar_lea.vmem %s17_s13, 256  ;;  %p126_p1 = scmp.lt.s32.totalorder %s17_s13, %s17_s13 }
   0x5   :  { %p122_p0 = scmp.ne.s32.totalorder %s17_s13, %s121_s14  ;;  %p127_p2 = scmp.lt.s32.totalorder %s121_s14, %s121_s14 }
   0x7   :  { %p128_p3 = por %p127_p2, %p126_p1 }
   0x9   :  { %p129_p4 = pnand %p128_p3, %p122_p0 }
   0xb   :  { %132 = shalt.err (!%p129_p4)
}
   0xc   :  { %s180_s15 = smov 128   ;;  %s181_s16 = smov 8  }
   0xd   :  { %22 = dma.hbm_to_vmem [thread:$0]  %s217_s0, 256, %s17_s13, [#allocation3], %s180_s15, %s180_s15, %s181_s16  }
   0xe   :  { %s182_s19 = smov [#allocation5]  }
   0xf   :  { %s29_s20 = sshll.u32 %s182_s19, 4  ;;  %s30_s20 = int_to_ptr.vmem [resolvable:$true] %s29_s20 }
  0x10   :  { %s141_s21 = scalar_lea.vmem %s30_s20, 128  ;;  %p146_p6 = scmp.lt.s32.totalorder %s30_s20, %s30_s20 }
  0x11   :  { %p142_p5 = scmp.ne.s32.totalorder %s30_s20, %s141_s21  ;;  %p147_p7 = scmp.lt.s32.totalorder %s141_s21, %s141_s21 }
  0x13   :  { %p148_p8 = por %p147_p7, %p146_p6 }
  0x15   :  { %p149_p9 = pnand %p148_p8, %p142_p5 }
  0x17   :  { %152 = shalt.err (!%p149_p9)
}
  0x18   :  { %32 = dma.hbm_to_vmem [thread:$0]  %s218_s1, 128, %s30_s20, [#allocation6]  }
  0x19   :  { %173 = dma.done.wait [#allocation3], 256  }
  0x1a   :  { %174 = vsyncadd [#allocation3], 4294967040 }
  0x1b   :  { %175 = dma.done.wait [#allocation6], 128  }
  0x1c   :  { %176 = vsyncadd [#allocation6], 4294967168  ;;  %v41_v0 = vld [vmem:[#allocation2] sm:$0xff]  ;;  %v43_v1 = vld [vmem:[#allocation5] sm:$0xff]  ;;  %vm46_vm0 = vcmask 261120   ;;  %v183_v8 = vmov 0   ;;  %v73_v14 = vlaneseq }
  0x1d   :  { %v42_v2 = vld [vmem:[#allocation2 + $0x8] sm:$0xff]  ;;  %v44_v3 = vmul.f32 %v43_v1, %v41_v0  ;;  %v104_v5 = vld [vmem:[%s219_s2] ss:$0 sm:$0xff]  ;;  %111 = vset.pattern.permute.xlu1 %v183_v8  ;;  %112 = vset.pattern.permute.xlu0 %v183_v8  ;;  %s184_s1 = smov [#allocation7]   ;;  %vm83_vm1 = vcmask 1041409   ;;  %vm86_vm2 = vcmask 58368  }
  0x1e   :  { %v45_v4 = vmul.f32 %v43_v1, %v42_v2  ;;  %60 = vbcast.lane.b32.xlu1 %v104_v5, 256  ;;  %v74_v15 = vand.u32 127, %v73_v14  ;;  %v76_v16 = vshrl.u32 %v73_v14, 7  ;;  %s94_s2 = sshll.u32 %s184_s1, 4  ;;  %s95_s2 = int_to_ptr.vmem [resolvable:$true] %s94_s2 }
  0x1f   :  { %v47_v6 = vsel %vm46_vm0, %v44_v3, 0.0  ;;  %s153_s25 = scalar_lea.vmem %s95_s2, 32  ;;  %p158_p11 = scmp.lt.s32.totalorder %s95_s2, %s95_s2 }
  0x20   :  { %48 = vadd.xlane.f32.xlu0 %v47_v6  ;;  %v50_v7 = vsel %vm46_vm0, %v45_v4, 0.0  ;;  %v77_v17 = vsub.s32 %v74_v15, %v76_v16  ;;  %p154_p10 = scmp.ne.s32.totalorder %s95_s2, %s153_s25  ;;  %p159_p12 = scmp.lt.s32.totalorder %s153_s25, %s153_s25 }
  0x22   :  { %p160_p13 = por %p159_p12, %p158_p11 }
  0x24   :  { %51 = vadd.xlane.f32.xlu0 %v50_v7  ;;  %p161_p0 = pnand %p160_p13, %p154_p10 }
  0x90   :  { %v61_v9 = vpop.permute.xlu1 %60 }
  0xa9   :  { %v49_v10 = vpop.xlane.xlu0 %48 }
  0xaa   :  { %v63_v11 = vadd.f32 %v61_v9, %v49_v10 }
  0xac   :  { %68 = vperm.xlu1 %111, %v63_v11  }
  0xad   :  { %v52_v12 = vpop.xlane.xlu0 %51 }
  0xae   :  { %v64_v13 = vadd.f32 %v61_v9, %v52_v12 }
  0xb0   :  { %71 = vperm.xlu0 %112, %v64_v13  }
 0x127   :  { %v69_v18 = vpop.permute.xlu1 %68 }
 0x128   :  { %v78_v20 = vrot.slane %v69_v18, %v77_v17 }
 0x12b   :  { %v72_v19 = vpop.permute.xlu0 %71 }
 0x12c   :  { %v82_v21 = vrot.slane %v72_v19, %v77_v17 }
 0x12e   :  { %v84_v22 = vsel %vm83_vm1, %v82_v21, %v78_v20 }
 0x12f   :  { %87 = vst.msk [vmem:[#allocation7] sm:$0x3] %vm86_vm2, %v84_v22 }
 0x130   :  { %164 = shalt.err (!%p161_p0)
}
 0x131   :  { %97 = dma.vmem_to_hbm [thread:$0]  %s95_s2, 32, %s220_s3, [#allocation4]  }
 0x132   :  { %177 = dma.done.wait [#allocation4], 32  }
 0x133   :  { %178 = vsyncadd [#allocation4], 4294967264 }
 0x134   :  { %101 = vsyncpa [#allocation3], 1 }
 0x135   :  { %102 = vsyncpa [#allocation6], 1 }
 0x136   :  { %103 = vsyncpa [#allocation4], 1 }

</bundles_post_ra>
